<compile_context>
chip_gen: v7x
topology: tpu7x:2x2x1
jax: 0.10.0
libtpu: 0.0.40
codegen_flags: <defaults>
</compile_context>

<pallas_src>
import functools
import math
import numpy as np

import jax
import jax.numpy as jnp
from jax import lax
from jax.experimental import pallas as pl
from jax.experimental.pallas import tpu as pltpu

LANE = 128
SUB = 8


# ----------------------------------------------------------------------------
# Parameter initialization (deterministic, mirrors SincConv_fast.__init__)
# ----------------------------------------------------------------------------
def to_mel(hz):
    return 2595 * np.log10(1 + hz / 700)


def to_hz(mel):
    return 700 * (10 ** (mel / 2595) - 1)


def init_sinc_params(out_channels, kernel_size, sample_rate=16000,
                     min_low_hz=50, min_band_hz=50):
    if kernel_size % 2 == 0:
        kernel_size = kernel_size + 1

    low_hz = 30
    high_hz = sample_rate / 2 - (min_low_hz + min_band_hz)
    mel = np.linspace(to_mel(low_hz), to_mel(high_hz), out_channels + 1)
    hz = to_hz(mel)

    low_hz_ = jnp.asarray(hz[:-1], dtype=jnp.float32).reshape(-1, 1)       # (C, 1)
    band_hz_ = jnp.asarray(np.diff(hz), dtype=jnp.float32).reshape(-1, 1)  # (C, 1)

    n_lin = np.linspace(0, kernel_size / 2 - 1, num=int(kernel_size / 2))
    window_ = jnp.asarray(0.54 - 0.46 * np.cos(2 * math.pi * n_lin / kernel_size),
                          dtype=jnp.float32)                               # (K//2,)

    n = (kernel_size - 1) / 2.0
    n_ = jnp.asarray(2 * math.pi * np.arange(-n, 0).reshape(1, -1) / sample_rate,
                     dtype=jnp.float32)                                    # (1, K//2)

    return dict(low_hz_=low_hz_, band_hz_=band_hz_, window_=window_, n_=n_,
                sample_rate=sample_rate, min_low_hz=min_low_hz,
                min_band_hz=min_band_hz, kernel_size=kernel_size,
                out_channels=out_channels)


def make_filters(params):
    """Build the (C, K) sinc band-pass filter bank exactly as the torch forward."""
    low_hz_ = params["low_hz_"]
    band_hz_ = params["band_hz_"]
    window_ = params["window_"]
    n_ = params["n_"]
    sr = params["sample_rate"]
    min_low_hz = params["min_low_hz"]
    min_band_hz = params["min_band_hz"]

    low = min_low_hz + jnp.abs(low_hz_)                                    # (C, 1)
    high = jnp.clip(low + min_band_hz + jnp.abs(band_hz_), min_low_hz, sr / 2)
    band = (high - low)[:, 0]                                              # (C,)

    f_times_t_low = low @ n_                                               # (C, K//2)
    f_times_t_high = high @ n_                                             # (C, K//2)

    band_pass_left = ((jnp.sin(f_times_t_high) - jnp.sin(f_times_t_low))
                      / (n_ / 2)) * window_                                # (C, K//2)
    band_pass_center = 2 * band[:, None]                                   # (C, 1)
    band_pass_right = jnp.flip(band_pass_left, axis=1)                     # (C, K//2)

    band_pass = jnp.concatenate(
        [band_pass_left, band_pass_center, band_pass_right], axis=1)       # (C, K)
    band_pass = band_pass / (2 * band[:, None])
    return band_pass.astype(jnp.float32)


# ----------------------------------------------------------------------------
# Pallas conv1d kernel (in_channels == 1, stride=1, padding=0, dilation=1)
# ----------------------------------------------------------------------------
def _round_up(x, m):
    return ((x + m - 1) // m) * m


def _sinc_conv1d_kernel(fr_ref, w_ref, o_ref, col_ref, *, n_g, t_tile, precision):
    # fr_ref:  (1, 1, 8, win8)  8-phase framed waveform of this (batch, time tile):
    #                           fr_ref[0, 0, d, q] = x[t0 + d + q]
    # w_ref:   (C_pad, K_pad)   zero-padded filter bank (grid-resident)
    # o_ref:   (1, C_pad, t_tile) lane-dense output time tile
    # col_ref: (K_pad, t_tile)  im2col scratch: col[k, p] = x[t0 + k + p]
    #
    # Taps k = 8*g + d of group g form ONE dense (8, t_tile) block
    #   fr_ref[0, 0, :, 8*g : 8*g + t_tile]
    # so each group is a single load + single unmasked sublane-dense store.
    if n_g <= 16:
        # Small filter (K_pad <= 128): static unroll, static sub-128 lane offsets.
        for g in range(n_g):
            col_ref[g * SUB:(g + 1) * SUB, :] = (
                fr_ref[0, 0, :, g * SUB:g * SUB + t_tile])
    else:
        # Large filter (e.g. K=251): fori_loop over 128-tap super-groups so vreg
        # live ranges / code size stay bounded.  The super-group segment load is
        # 128-aligned (dynamic, hinted); the 16 group shifts inside are static
        # lane slices of that value; stores are dense (8, t_tile).
        n_super = n_g // 16

        def body(s, carry):
            base = pl.multiple_of(s * LANE, LANE)
            seg = fr_ref[0, 0, :, pl.ds(base, t_tile + LANE)]    # (8, t_tile+128)
            for m in range(16):
                col_ref[pl.ds(base + m * SUB, SUB), :] = (
                    seg[:, m * SUB:m * SUB + t_tile])
            return carry

        lax.fori_loop(0, n_super, body, 0, unroll=True)
        # Static tail groups (K_pad % 128 != 0).
        for g in range(n_super * 16, n_g):
            col_ref[g * SUB:(g + 1) * SUB, :] = (
                fr_ref[0, 0, :, g * SUB:g * SUB + t_tile])

    # One MXU matmul with f32 accumulation.  Default precision (bf16 operands)
    # per perf review; the padded filter columns are zero so the (finite) extra
    # col rows contribute nothing.
    o_ref[0] = jnp.dot(
        w_ref[...], col_ref[...],
        precision=precision,
        preferred_element_type=jnp.float32,
    ).astype(o_ref.dtype)


def _frame_waveform(waveforms, n_t, t_tile, win8, t_x):
    """frames[b, j, d, q] = x_padded[b, j*t_tile + d + q] -> (B, n_t, 8, win8)."""
    B, _, T = waveforms.shape
    xp = jnp.pad(waveforms[:, 0, :], ((0, 0), (0, t_x - T)))
    idx = (jnp.arange(n_t)[:, None, None] * t_tile
           + jnp.arange(SUB)[None, :, None]
           + jnp.arange(win8)[None, None, :])                   # (n_t, 8, win8)
    return xp[:, idx]                                           # (B, n_t, 8, win8)


def sinc_conv1d(waveforms, filters, stride=1, padding=0, dilation=1,
                t_tile=2048, precision=None):
    """waveforms: (B, 1, T) NCW; filters: (C, K). Returns (B, C, T_out)."""
    # TODO(synk): only stride=1, dilation=1 implemented in-kernel (module defaults).
    assert stride == 1 and dilation == 1, "only default stride/dilation supported"
    if padding:
        waveforms = jnp.pad(waveforms, ((0, 0), (0, 0), (padding, padding)))

    B, in_ch, T = waveforms.shape
    assert in_ch == 1, "SincConv only supports one input channel"
    C, K = filters.shape
    T_out = T - K + 1
    assert T_out >= 1, "waveform shorter than kernel"

    # Lane-dense time tiling (t_tile multiple of 128); padded output sliced later.
    t_out_128 = _round_up(T_out, LANE)
    t_tile = max(LANE, min(_round_up(t_tile, LANE), t_out_128))
    n_t = pl.cdiv(t_out_128, t_tile)
    T_out_pad = n_t * t_tile

    C_pad = _round_up(C, SUB)                # sublane-aligned channel rows
    K_pad = _round_up(K, SUB)                # sublane-aligned contraction dim
    n_g = K_pad // SUB                       # 8-tap groups

    halo8 = _round_up(K_pad - SUB, LANE)     # extra lanes each frame block needs
    win8 = t_tile + halo8                    # per-tile frame length (mult. of 128)
    t_x = T_out_pad + halo8 + (SUB - 1)      # padded waveform length (>= T)

    frames = _frame_waveform(waveforms, n_t, t_tile, win8, t_x)
    w = jnp.pad(filters, ((0, C_pad - C), (0, K_pad - K)))

    kernel = functools.partial(_sinc_conv1d_kernel, n_g=n_g, t_tile=t_tile,
                               precision=precision)

    # Explicit VMEM budget (col scratch + double-buffered in/out blocks), with
    # headroom, clamped to [32 MiB default, 64 MiB v7x-safe].
    vmem_need = 4 * (K_pad * t_tile + 2 * C_pad * t_tile
                     + 2 * SUB * win8 + 2 * C_pad * K_pad)
    vmem_limit = int(min(max(2 * vmem_need, 32 * 1024 * 1024), 64 * 1024 * 1024))

    out = pl.pallas_call(
        kernel,
        out_shape=jax.ShapeDtypeStruct((B, C_pad, T_out_pad), waveforms.dtype),
        grid_spec=pltpu.PrefetchScalarGridSpec(
            num_scalar_prefetch=0,
            grid=(B, n_t),
            in_specs=[
                # Per-(batch, tile) 8-phase frame block: O(t_tile + K) VMEM,
                # auto double-buffered (bounded residency, v7x-safe).
                pl.BlockSpec((1, 1, SUB, win8), lambda b, j: (b, j, 0, 0)),
                # Filter bank, resident across the whole grid.
                pl.BlockSpec((C_pad, K_pad), lambda b, j: (0, 0)),
            ],
            out_specs=pl.BlockSpec((1, C_pad, t_tile), lambda b, j: (b, 0, j)),
            scratch_shapes=[pltpu.VMEM((K_pad, t_tile), jnp.float32)],
        ),
        compiler_params=pltpu.CompilerParams(
            dimension_semantics=("parallel", "parallel"),
            vmem_limit_bytes=vmem_limit,
        ),
    )(frames, w)

    return out[:, :C, :T_out]


def sinc_conv_fast_forward(params, waveforms, stride=1, padding=0, dilation=1,
                           t_tile=2048, precision=None):
    filters = make_filters(params)                    # (C, K) — glue / param setup
    return sinc_conv1d(waveforms, filters, stride, padding, dilation,
                       t_tile=t_tile, precision=precision)


# ----------------------------------------------------------------------------
# Reference (pure JAX) for correctness check
# ----------------------------------------------------------------------------
def reference_forward(params, waveforms):
    filters = make_filters(params)[:, None, :]        # (C, 1, K) OIH
    return jax.lax.conv_general_dilated(
        waveforms, filters, window_strides=(1,), padding="VALID",
        dimension_numbers=("NCH", "OIH", "NCH"),
        precision=jax.lax.Precision.HIGHEST)


if __name__ == "__main__":
    out_channels = 10         # not a multiple of 8 -> exercises channel padding
    kernel_size = 16          # bumped to 17 (odd), as in the torch module
    sample_rate = 16000
    batch = 2
    n_samples = 200           # T_out = 184 -> two 128-wide lane-dense time tiles

    params = init_sinc_params(out_channels, kernel_size, sample_rate)

    key = jax.random.PRNGKey(0)
    waveforms = jax.random.normal(key, (batch, 1, n_samples), dtype=jnp.float32)

    # Fast path: DEFAULT MXU precision (bf16 operands, f32 accumulation).
    out = sinc_conv_fast_forward(params, waveforms, t_tile=128)
    out = jax.block_until_ready(out)

    ref = jax.block_until_ready(reference_forward(params, waveforms))

    expected_shape = (batch, out_channels, n_samples - params["kernel_size"] + 1)
    assert out.shape == expected_shape, (out.shape, expected_shape)
    # Loose tolerance for the bf16-operand MXU pass; indexing/structural bugs
    # produce O(1) errors and still trip this.
    assert np.allclose(np.asarray(out), np.asarray(ref), rtol=1e-1, atol=1e-1), (
        "Pallas output mismatch vs reference (default precision)")

    # Strict structural check: same kernel, full-precision matmul.
    out_hi = jax.block_until_ready(
        sinc_conv_fast_forward(params, waveforms, t_tile=128,
                               precision=jax.lax.Precision.HIGHEST))
    assert np.allclose(np.asarray(out_hi), np.asarray(ref), rtol=1e-4, atol=1e-4), (
        "Pallas output mismatch vs reference (HIGHEST precision)")

    print("KERNEL_OK")
</pallas_src>

<mosaic_0001>
module attributes {stable_mosaic.version = 11 : i64} {
  func.func @_sinc_conv1d_kernel(%arg0: i32, %arg1: i32, %arg2: memref<1x1x8x256xf32, #tpu.memory_space<vmem>>, %arg3: memref<16x24xf32, #tpu.memory_space<vmem>>, %arg4: memref<1x16x128xf32, #tpu.memory_space<vmem>>, %arg5: memref<24x128xf32, #tpu.memory_space<vmem>>) attributes {dimension_semantics = [#tpu.dimension_semantics<parallel>, #tpu.dimension_semantics<parallel>], iteration_bounds = array<i64: 2, 2>, scalar_prefetch = 0 : i64, scratch_operands = 1 : i64, tpu.core_type = #tpu.core_type<tc>, window_params = [{transform_indices = @transform_0, window_bounds = array<i64: 1, 1, 8, 256>}, {pipeline_mode = #tpu.pipeline_mode<synchronous>, transform_indices = @transform_1, window_bounds = array<i64: 16, 24>}, {transform_indices = @transform_2, window_bounds = array<i64: 1, 16, 128>}]} {
    %c0 = arith.constant 0 : index
    %c0_0 = arith.constant 0 : index
    %c0_1 = arith.constant 0 : index
    %c0_2 = arith.constant 0 : index
    %0 = vector.load %arg2[%c0, %c0_0, %c0_1, %c0_2] : memref<1x1x8x256xf32, #tpu.memory_space<vmem>>, vector<1x1x8x128xf32>
    %1 = vector.shape_cast %0 : vector<1x1x8x128xf32> to vector<8x128xf32>
    %c0_3 = arith.constant 0 : index
    %c0_4 = arith.constant 0 : index
    %2 = vector.load %arg5[%c0_3, %c0_4] : memref<24x128xf32, #tpu.memory_space<vmem>>, vector<8x128xf32>
    tpu.vector_store %arg5[%c0_3, %c0_4], %1 {strides = array<i32>} : memref<24x128xf32, #tpu.memory_space<vmem>>, vector<8x128xf32>,
    %c0_5 = arith.constant 0 : index
    %c0_6 = arith.constant 0 : index
    %c0_7 = arith.constant 0 : index
    %c8 = arith.constant 8 : index
    %3 = vector.load %arg2[%c0_5, %c0_6, %c0_7, %c8] : memref<1x1x8x256xf32, #tpu.memory_space<vmem>>, vector<1x1x8x128xf32>
    %4 = vector.shape_cast %3 : vector<1x1x8x128xf32> to vector<8x128xf32>
    %c8_8 = arith.constant 8 : index
    %c0_9 = arith.constant 0 : index
    %5 = vector.load %arg5[%c8_8, %c0_9] : memref<24x128xf32, #tpu.memory_space<vmem>>, vector<8x128xf32>
    tpu.vector_store %arg5[%c8_8, %c0_9], %4 {strides = array<i32>} : memref<24x128xf32, #tpu.memory_space<vmem>>, vector<8x128xf32>,
    %c0_10 = arith.constant 0 : index
    %c0_11 = arith.constant 0 : index
    %c0_12 = arith.constant 0 : index
    %c16 = arith.constant 16 : index
    %6 = vector.load %arg2[%c0_10, %c0_11, %c0_12, %c16] : memref<1x1x8x256xf32, #tpu.memory_space<vmem>>, vector<1x1x8x128xf32>
    %7 = vector.shape_cast %6 : vector<1x1x8x128xf32> to vector<8x128xf32>
    %c16_13 = arith.constant 16 : index
    %c0_14 = arith.constant 0 : index
    %8 = vector.load %arg5[%c16_13, %c0_14] : memref<24x128xf32, #tpu.memory_space<vmem>>, vector<8x128xf32>
    tpu.vector_store %arg5[%c16_13, %c0_14], %7 {strides = array<i32>} : memref<24x128xf32, #tpu.memory_space<vmem>>, vector<8x128xf32>,
    %c0_15 = arith.constant 0 : index
    %c0_16 = arith.constant 0 : index
    %9 = vector.load %arg3[%c0_15, %c0_16] : memref<16x24xf32, #tpu.memory_space<vmem>>, vector<16x24xf32>
    %c0_17 = arith.constant 0 : index
    %c0_18 = arith.constant 0 : index
    %10 = vector.load %arg5[%c0_17, %c0_18] : memref<24x128xf32, #tpu.memory_space<vmem>>, vector<24x128xf32>
    %cst = arith.constant dense<0.000000e+00> : vector<16x128xf32>
    %11 = tpu.matmul %9, %10, %cst {dimension_numbers = #tpu.dot_dimension_numbers<[1], [0], [0], [1], [0, 0, 1, 1], [], []>} : vector<16x24xf32>, vector<24x128xf32>, vector<16x128xf32> -> vector<16x128xf32>
    %c0_19 = arith.constant 0 : index
    %c0_20 = arith.constant 0 : index
    %c0_21 = arith.constant 0 : index
    %12 = vector.load %arg4[%c0_19, %c0_20, %c0_21] : memref<1x16x128xf32, #tpu.memory_space<vmem>>, vector<1x16x128xf32>
    %13 = vector.shape_cast %12 : vector<1x16x128xf32> to vector<16x128xf32>
    %14 = vector.shape_cast %11 : vector<16x128xf32> to vector<1x16x128xf32>
    tpu.vector_store %arg4[%c0_19, %c0_20, %c0_21], %14 {strides = array<i32>} : memref<1x16x128xf32, #tpu.memory_space<vmem>>, vector<1x16x128xf32>,
    return
  }
  func.func @transform_0(%arg0: i32, %arg1: i32) -> (i32, i32, i32, i32) {
    %c0_i32 = arith.constant 0 : i32
    %c0_i32_0 = arith.constant 0 : i32
    %c0_i32_1 = arith.constant 0 : i32
    return %arg0, %arg1, %c0_i32, %c0_i32_0 : i32, i32, i32, i32
  }
  func.func @transform_1(%arg0: i32, %arg1: i32) -> (i32, i32) {
    %c0_i32 = arith.constant 0 : i32
    %c0_i32_0 = arith.constant 0 : i32
    %c0_i32_1 = arith.constant 0 : i32
    return %c0_i32, %c0_i32_0 : i32, i32
  }
  func.func @transform_2(%arg0: i32, %arg1: i32) -> (i32, i32, i32) {
    %c0_i32 = arith.constant 0 : i32
    %c0_i32_0 = arith.constant 0 : i32
    return %arg0, %c0_i32, %arg1 : i32, i32, i32
  }
}

</mosaic_0001>

<bundles_post_ra>
// kernel: tpu_custom_call.1
= control target key start
LH: loop header
LB: loop body
LE: loop exit
PB: predicated region body
PF: predicated region fallthrough
CT: control target
= control target key end

     0   :  { %s994_s0 = inlined_call_operand.hbm [shape: f32[2,2,8,256], index: 0, kind: input, shape index: {}]   ;;  %s995_s1 = inlined_call_operand.hbm [shape: f32[16,24], index: 1, kind: input, shape index: {}]   ;;  %s996_s2 = inlined_call_operand.hbm [shape: f32[2,16,256], index: 2, kind: output, shape index: {}]  }
   0x1   :  { %1004 = sst [smem:[#allocation15_spill]] %s995_s1 }
   0x2   :  { %7 = vsyncpa [#allocation4], 0 }
   0x3   :  { %9 = vsyncpa [#allocation4 + $0x1], 0 }
   0x4   :  { %10 = vsyncpa [#allocation7], 0 }
   0x5   :  { %11 = vsyncpa [#allocation5], 0 }
   0x6   :  { %13 = vsyncpa [#allocation5 + $0x1], 0  ;;  %s748_s9 = smov 0   ;;  %s750_s10 = smov 0  }
   0x7   :  { %s752_s11 = smov 0   ;;  %s754_s12 = smov 0  }
   0x8   :  { %s756_s13 = smov 0   ;;  %s758_s14 = smov 0  }
   0x9   :  { %s760_s15 = smov 0   ;;  %s762_s16 = smov 0  }
   0xa LB: > { %1005 = sst [smem:[#allocation12_spill]] %s713_s14  ;;  %s422_s17 = sadd.s32 4294967295, %s721_s16   ;;  %s721_s16 = sphi %s762_s16, %s19_s16   ;;  %s717_s15 = sphi %s760_s15, %s1030_s15   ;;  %s713_s14 = sphi %s758_s14, %s1024_s14   ;;  %s709_s13 = sphi %s756_s13, %s1029_s13   ;;  %s705_s12 = sphi %s754_s12, %s1023_s12   ;;  %s701_s11 = sphi %s752_s11, %s1028_s11   ;;  %s697_s10 = sphi %s750_s10, %s1027_s10   ;;  %s693_s9 = sphi %s748_s9, %s1026_s9  }
   0xb   : > { %s423_s18 = sadd.s32 4294967294, %s721_s16   ;;  %p53_p0 = scmp.ne.s32.totalorder %s697_s10, %s693_s9 }
   0xc   : > { %p792_p1 = scmp.eq.s32.totalorder %s422_s17, 0  ;;  %p796_p2 = scmp.eq.s32.totalorder %s422_s17, 3 }
   0xd   : > { %p106_p3 = scmp.eq.s32.totalorder %s423_s18, 3  ;;  %p424_p5 = scmp.ge.s32.totalorder %s721_s16, 1 }
   0xe   : > { %s1006_s19 = scalar_select %p792_p1, 1, 0 }
   0xf   : > { %s1007_s20 = scalar_select %p796_p2, 1, 0 }
  0x10   : > { %p802_p4 = por %p792_p1, %p53_p0  ;;  %p807_p6 = por %p106_p3, %p53_p0 }
  0x11   : > { %p113_p7 = scmp.lt.s32.totalorder %s721_s16, 5  ;;  %s723_s24 = smov [#allocation6]  }
  0x12   : > { %s1008_s21 = scalar_select %p802_p4, 1, 0 }
  0x13   : > { %s1009_s22 = scalar_select %p807_p6, 1, 0 }
  0x14   : > { %p812_p8 = pnand %p424_p5, %p113_p7  ;;  %s125_s25 = sshll.u32 %s723_s24, 4  ;;  %s126_s25 = int_to_ptr.vmem [resolvable:$true] %s125_s25 }
  0x15   : > { %s1012_s1 = sld [smem:[#allocation15_spill]] }
  0x16   : > { %s1010_s23 = scalar_select %p812_p8, 1, 0 }
  0x17   : > { %p468_p9 = pneg %p812_p8 }
  0x19   : > { %p820_p10 = pnand %p468_p9, %p792_p1 }
  0x1b   : > { %s561_s29 = scalar_lea.hbm %s1012_s1, 256  ;;  %p563_p12 = pneg %p820_p10 }
  0x1c   : > { %p562_p11 = scmp.ne.s32.totalorder %s1012_s1, %s561_s29  ;;  %p568_p3 = scmp.lt.u32.totalorder %s561_s29, %s1012_s1 }
  0x1e   : > { %p564_p13 = pnand %p563_p12, %p562_p11 }
  0x20   : > { %p565_p0 = pneg %p564_p13 }
  0x22   : > { %p570_p5 = pnand %p568_p3, %p565_p0 }
  0x24   : > { %573 = shalt.err (!%p570_p5)
}
  0x25   : > { %s574_s6 = scalar_lea.vmem %s126_s25, 256  ;;  %p582_p1 = scmp.lt.s32.totalorder %s126_s25, %s126_s25 }
  0x26   : > { %p575_p7 = scmp.ne.s32.totalorder %s126_s25, %s574_s6  ;;  %p583_p4 = scmp.lt.s32.totalorder %s574_s6, %s574_s6 }
  0x28   : > { %p577_p9 = pnand %p575_p7, %p563_p12  ;;  %p584_p8 = por %p583_p4, %p582_p1 }
  0x2a   : > { %p578_p6 = pneg %p577_p9 }
  0x2c   : > { %p585_p2 = pnand %p584_p8, %p578_p6 }
  0x2e   : > { %588 = shalt.err (!%p585_p2)
}
  0x2f   : > { %s724_s7 = smov 128   ;;  %s725_s8 = smov 8  }
  0x30   : > { %471 = dma.hbm_to_vmem [thread:$0]  (!%p820_p10), %s1012_s1, 256, %s126_s25, [#allocation7], %s724_s7, %s724_s7, %s725_s8  }
  0x31   : > { %s28_s24 = sadd.s32 1, %s713_s14  ;;  %s31_s27 = sadd.s32 1, %s717_s15 }
  0x32   : > { %p29_p1 = scmp.ge.s32.totalorder %s28_s24, 2  ;;  %s40_s28 = sadd.s32 1, %s701_s11 }
  0x33   : > { %p47_p2 = scmp.ne.s32.totalorder %s701_s11, %s697_s10  ;;  %p48_p4 = scmp.eq.s32.totalorder %s721_s16, 0 }
  0x34   : > { %s1032_s24 = smov (%p29_p1, %s28_s24), 0  ;;  %s1034_s27 = smov (!%p29_p1, %s31_s27), %s717_s15 }
  0x35   : > { %1013 = sst [smem:[#allocation13_spill]] %s1032_s24  ;;  %s36_s29 = ssub.s32 %s713_s14, %s1032_s24 }
  0x36   : > { %p33_p6 = scmp.ge.s32.totalorder %s1034_s27, 2  ;;  %p1014_p8 = scmp.ne.s32.totalorder %s1007_s20, 0 }
  0x37   : > { %p857_p10 = por %p48_p4, %p47_p2  ;;  %p481_p12 = scmp.lt.s32.totalorder %s721_s16, 4 }
  0x38   : > { %p853_p11 = por %p1014_p8, %p47_p2  ;;  %s1036_s27 = smov (%p33_p6, %s1034_s27), 0 }
  0x39   : > { %1017 = sst [smem:[#allocation14_spill]] %s1036_s27  ;;  %s139_s30 = sand.u32 1, %s701_s11  }
  0x3a   : > { %s428_s3 = sshll.u32 %s713_s14, 1  ;;  %s35_s4 = ssub.s32 %s717_s15, %s1036_s27 }
  0x3b   : > { %s37_s5 = sor.u32 %s36_s29, %s35_s4  ;;  %s427_s6 = sshll.u32 %s139_s30, 4 }
  0x3c   : > { %p38_p13 = scmp.eq.s32.totalorder %s37_s5, 0  ;;  %s429_s20 = sshll.u32 %s717_s15, 2 }
  0x3d   : > { %s143_s7 = scalar_lea.vmem [#allocation3], %s427_s6  ;;  %s149_s18 = sadd.s32 %s429_s20, %s428_s3 }
  0x3e   : > { %s153_s8 = sshll.u32 %s143_s7, 4  ;;  %s430_s1 = sshll.u32 %s149_s18, 7  ;;  %s872_s8 = int_to_ptr.vmem [resolvable:$true] %s153_s8 }
  0x3f   : > { %s870_s17 = scalar_select %p38_p13, %s701_s11, %s40_s28  }
  0x40   : > { %p878_p0 = pnand %p481_p12, %p857_p10  ;;  %s885_s29 = scalar_lea.hbm %s994_s0, %s430_s1 }
  0x41   : > { %s140_s28 = scalar_lea.sflag [#allocation4], %s139_s30  ;;  %s589_s3 = scalar_lea.hbm %s885_s29, 256 }
  0x42   : > { %p590_p3 = scmp.ne.s32.totalorder %s885_s29, %s589_s3  ;;  %p591_p5 = pneg %p878_p0 }
  0x43   : > { %s594_s14 = scalar_lea.hbm %s994_s0, 1024  ;;  %p595_p1 = scmp.lt.u32.totalorder %s885_s29, %s994_s0 }
  0x44   : > { %p592_p7 = pnand %p591_p5, %p590_p3  ;;  %p596_p2 = scmp.lt.u32.totalorder %s594_s14, %s589_s3 }
  0x45   : > { %p598_p6 = scmp.lt.u32.totalorder %s589_s3, %s885_s29 }
  0x46   : > { %p593_p9 = pneg %p592_p7  ;;  %p597_p4 = por %p596_p2, %p595_p1 }
  0x48   : > { %p599_p8 = por %p598_p6, %p597_p4 }
  0x4a   : > { %p600_p10 = pnand %p599_p8, %p593_p9 }
  0x4c   : > { %603 = shalt.err (!%p600_p10)
}
  0x4d   : > { %s604_s30 = scalar_lea.vmem %s872_s8, 256  ;;  %s726_s5 = smov [#allocation3]  }
  0x4e   : > { %p605_p12 = scmp.ne.s32.totalorder %s872_s8, %s604_s30  ;;  %s609_s6 = sshll.u32 %s726_s5, 4  ;;  %s610_s6 = int_to_ptr.vmem [resolvable:$false] %s609_s6 }
  0x4f   : > { %s611_s20 = scalar_lea.vmem %s610_s6, 512  ;;  %p612_p7 = scmp.lt.s32.totalorder %s872_s8, %s610_s6 }
  0x50   : > { %p607_p13 = pnand %p605_p12, %p591_p5  ;;  %p613_p1 = scmp.lt.s32.totalorder %s611_s20, %s604_s30 }
  0x52   : > { %p608_p3 = pneg %p607_p13  ;;  %p614_p2 = por %p613_p1, %p612_p7 }
  0x54   : > { %p615_p4 = pnand %p614_p2, %p608_p3 }
  0x56   : > { %618 = shalt.err (!%p615_p4)
}
  0x57   : > { %475 = dma.hbm_to_vmem [thread:$0]  (!%p878_p0), %s885_s29, 256, %s872_s8, %s140_s28  }
  0x58   : > { %p1019_p9 = scmp.ne.s32.totalorder %s1010_s23, 0 }
  0x59   : > { %s915_s7 = sand.u32 (!%p1019_p9), 1, %s697_s10   ;;  %p1020_p5 = scmp.ne.s32.totalorder (!%p1019_p9), %s1008_s21, 0 }
  0x5a   : > { %162 = sbr.rel (%p1019_p9) target bundleno = 459 (0x1cb), region = 28  ;;  %s432_s18 = sshll.u32 (!%p1019_p9), %s915_s7, 4 }
  0x5b   : > { %s165_s3 = scalar_lea.sflag (!%p1019_p9), [#allocation4], %s915_s7  ;;  %s168_s25 = scalar_lea.vmem (!%p1019_p9), [#allocation3], %s432_s18 }
  0x61   : > { %680 = dma.done.wait (%p1020_p5), %s165_s3, 256  }
  0x62   : > { %682 = vsyncadd (%p1020_p5), %s165_s3, 4294967040  ;;  %p1021_p0 = scmp.ne.s32.totalorder %s1006_s19, 0 }
  0x64   : > { %684 = dma.done.wait (%p1021_p0), [#allocation7], 256  }
  0x65   : > { %686 = vsyncadd (%p1021_p0), [#allocation7], 4294967040  ;;  %vm224_vm0 = vcmask 195584   ;;  %v195_v0 = vld [vmem:[%s168_s25] sm:$0xff]  ;;  %v196_v1 = vld [vmem:[%s168_s25 + $0x8] sm:$0xff]  ;;  %s727_s23 = smov 112  }
  0x66   : > { %v219_v2 = vld [vmem:[#allocation6] sm:$0xff]  ;;  %v556_v3 = vpack.i.bf16 %v196_v1, %v195_v0  ;;  %213 = vrot.lane.b32.xlu1 %v196_v1, %s727_s23  ;;  %s728_s24 = smov 120   ;;  %vm203_vm1 = vcmask 982016   ;;  %vm215_vm2 = vcmask 916480   ;;  %v220_v12 = vld [vmem:[#allocation6 + $0x8] sm:$0xff]  ;;  %s438_s19 = sshll.u32 %s709_s13, 2 }
  0x67   : > { %453 = vmatprep.mubr.msk.f32.mxu0 %vm224_vm0, %v219_v2  ;;  %s320_s21 = sadd.s32 %s705_s12, %s438_s19  ;;  %s192_s8 = scalar_lea.vmem [#allocation8], %s432_s18 }
  0x68   : > { %557 = vrot.lane.b32.xlu0 %v556_v3, %s728_s24  ;;  %s323_s29 = sshll.u32 %s192_s8, 4  ;;  %s439_s28 = sshll.u32 %s320_s21, 7  ;;  %s935_s29 = int_to_ptr.vmem [resolvable:$true] %s323_s29 }
  0x69   : > { %s940_s27 = scalar_lea.hbm %s996_s2, %s439_s28  ;;  %s309_s13 = scalar_lea.sflag [#allocation5], %s915_s7 }
  0x6a   : > { %s619_s12 = scalar_lea.vmem %s935_s29, 256  ;;  %s729_s1 = smov [#allocation8]  }
  0x6b   : > { %p620_p6 = scmp.ne.s32.totalorder %s935_s29, %s619_s12  ;;  %s623_s30 = sshll.u32 %s729_s1, 4  ;;  %s624_s30 = int_to_ptr.vmem [resolvable:$false] %s623_s30 }
  0x6c   : > { %211 = vrot.lane.b32.xlu0 %v195_v0, %s727_s23  ;;  %s625_s5 = scalar_lea.vmem %s624_s30, 512  ;;  %p626_p12 = scmp.lt.s32.totalorder %s935_s29, %s624_s30 }
  0x6d   : > { %p621_p8 = pnand %p620_p6, %p853_p11  ;;  %p627_p13 = scmp.lt.s32.totalorder %s625_s5, %s619_s12 }
  0x6f   : > { %p622_p10 = pneg %p621_p8  ;;  %p628_p3 = por %p627_p13, %p626_p12 }
  0x71   : > { %p629_p7 = pnand %p628_p3, %p622_p10 }
  0xd8   : > { %v214_v7 = vpop.permute.xlu1 %213 }
  0xda   : > { %v558_v4 = vpop.permute.xlu0 %557 }
  0xdb   : > { %v560_v5 = vunpack.i.h.bf16 %v558_v4  ;;  %v559_v6 = vunpack.i.l.bf16 %v558_v4 }
  0xdd   : > { %v204_v8 = vsel %vm203_vm1, %v559_v6, %v560_v5 }
  0xde   : > { %v456_v9 = vpack.c.bf16 %v204_v8, %v195_v0  ;;  %v212_v10 = vpop.permute.xlu0 %211 }
  0xdf   : > { %v216_v11 = vsel %vm215_vm2, %v212_v10, %v214_v7 }
  0xe0   : > { %457 = vmatprep.subr.bf16.mxu0 %v456_v9 }
  0xe1   : > { %459 = vmatpush3.bf16.msra.mxu0 %v456_v9 }
  0xe2   : > { %451 = vmatprep.subr.mxu0 %v216_v11 }
  0xe5   : > { %452 = vmatpush3.msra.mxu0 %v216_v11 }
  0xe6   : > { %454 = vmatmul.mubr.msk.f32.vlgmr.msra.gmra.mrb[0].mxu0 %vm224_vm0, %v220_v12 }
 0x1b9   : > { %v455_v13 = vpop.f32.mrb[0].mxu0 }
 0x1ba   : > { %307 = vst [vmem:[%s192_s8 + $0x8] sm:$0xff] %v455_v13  ;;  %v297_v14 = vpop.f32.mrb[1].mxu0 }
 0x1bb   : > { %306 = vst [vmem:[%s192_s8] sm:$0xff] %v297_v14 }
 0x1bc   : > { %632 = shalt.err (!%p629_p7)
}
 0x1bd   : > { %s633_s6 = scalar_lea.hbm %s940_s27, 256  ;;  %s637_s3 = scalar_lea.hbm %s996_s2, 1024 }
 0x1be   : > { %p634_p1 = scmp.ne.s32.totalorder %s940_s27, %s633_s6  ;;  %p638_p9 = scmp.lt.u32.totalorder %s940_s27, %s996_s2 }
 0x1bf   : > { %p639_p5 = scmp.lt.u32.totalorder %s637_s3, %s633_s6  ;;  %p641_p6 = scmp.lt.u32.totalorder %s633_s6, %s940_s27 }
 0x1c0   : > { %p635_p2 = pnand %p634_p1, %p853_p11 }
 0x1c1   : > { %p640_p0 = por %p639_p5, %p638_p9 }
 0x1c2   : > { %p636_p4 = pneg %p635_p2 }
 0x1c3   : > { %p642_p8 = por %p641_p6, %p640_p0 }
 0x1c5   : > { %p643_p10 = pnand %p642_p8, %p636_p4 }
 0x1c7   : > { %646 = shalt.err (!%p643_p10)
}
 0x1c8   : > { %s730_s24 = smov 128   ;;  %s731_s19 = smov 256  }
 0x1c9   : > { %s732_s21 = smov 8  }
 0x1ca   : > { %466 = dma.vmem_to_hbm [thread:$0]  (%p853_p11), %s935_s29, 256, %s940_s27, %s309_s13, %s730_s24, %s731_s19, %s732_s21  }
 0x1cb PF: > { %p483_p12 = scmp.ge.s32.totalorder %s721_s16, 2  ;;  %s338_s8 = sand.u32 1, %s693_s9  }
 0x1cc   : > { %p1022_p13 = scmp.ne.s32.totalorder %s1009_s22, 0  ;;  %s339_s28 = scalar_lea.sflag [#allocation5], %s338_s8 }
 0x1ce   : > { %p477_p3 = pnand %p483_p12, %p1022_p13 }
 0x1d0   : > { %688 = dma.done.wait (!%p477_p3), %s339_s28, 256  }
 0x1d1   : > { %690 = vsyncadd (!%p477_p3), %s339_s28, 4294967040  ;;  %s19_s16 = sadd.s32 1, %s721_s16   ;;  %s1023_s12 = sld [smem:[#allocation12_spill]] }
 0x1d2   : > { %p16_p7 = scmp.ge.s32.totalorder %s19_s16, 6   ;;  %s1024_s14 = sld [smem:[#allocation13_spill]] }
 0x1d3   : > { %s1025_s26 = sld [smem:[#allocation14_spill]]  ;;  %s1026_s9 = smov %s697_s10 }
 0x1d4   : > { %s1027_s10 = smov %s701_s11  ;;  %s1028_s11 = smov %s870_s17 }
 0x1d5   : > { %s1029_s13 = smov %s717_s15  ;;  %18 = sbr.rel (!%p16_p7) target bundleno = 10 (0xa), region = 77 }
 0x1d9   : > { %s1030_s15 = smov %s1025_s26 }
 0x1dc   :  { %344 = vsyncpa [#allocation4], 1 }
 0x1dd   :  { %346 = vsyncpa [#allocation4 + $0x1], 1 }
 0x1de   :  { %347 = vsyncpa [#allocation7], 1 }
 0x1df   :  { %348 = vsyncpa [#allocation5], 1 }
 0x1e0   :  { %350 = vsyncpa [#allocation5 + $0x1], 1 }

</bundles_post_ra>
